<compile_context>
chip_gen: v7x
topology: tpu7x:2x2x1
jax: 0.10.0
libtpu: 0.0.40
codegen_flags: <defaults>
</compile_context>

<pallas_src>
import functools

import jax
import jax.numpy as jnp
import numpy as np
from jax.experimental import pallas as pl
from jax.experimental.pallas import tpu as pltpu


def _round_up(x, m):
    return ((x + m - 1) // m) * m


# --------------------------------------------------------------------------
# Fused single-pass kernel: conv -> GroupNorm (two-pass variance) -> ReLU
# --------------------------------------------------------------------------
def _fused_conv_gn_act_kernel(p_ref, w_ref, a_ref, g_ref, o_ref, y_scr,
                              *, hw, inv_n, eps, has_act):
    # p_ref : (1, HW_pad, K_pad) bf16   im2col patches, one sample
    # w_ref : (K_pad, C_pad)     bf16   folded conv weight
    # a_ref : (C_pad, C_pad)     f32    same-group indicator (0/1)
    # g_ref : (2, C_pad)         f32    row0 = gamma, row1 = beta
    # o_ref : (1, HW_pad, C_pad) x.dtype  final output
    # y_scr : (HW_pad, C_pad)    f32    conv output, VMEM-resident
    hw_pad = y_scr.shape[0]
    y_scr[...] = jnp.dot(p_ref[0], w_ref[...],
                         preferred_element_type=jnp.float32)

    # Per-channel broadcast of the per-group mean: sum_rows(y @ A) / (gsz*HW).
    # Padded spatial rows are exactly zero (zero patches) so they don't bias
    # the sums; padded channels have zero columns in A.
    mean_c = jnp.sum(
        jnp.dot(y_scr[...], a_ref[...], preferred_element_type=jnp.float32),
        axis=0, keepdims=True) * inv_n                        # (1, C_pad)

    # Two-pass variance; mask padded spatial rows (y=0 there, mean != 0).
    d = y_scr[...] - mean_c
    if hw != hw_pad:
        row_ok = jax.lax.broadcasted_iota(jnp.int32, (hw_pad, 1), 0) < hw
        d = jnp.where(row_ok, d, 0.0)
    var_c = jnp.sum(
        jnp.dot(d * d, a_ref[...], preferred_element_type=jnp.float32),
        axis=0, keepdims=True) * inv_n                        # (1, C_pad)

    scale = g_ref[0:1, :] * jax.lax.rsqrt(var_c + eps)
    shift = g_ref[1:2, :] - mean_c * scale
    out = y_scr[...] * scale + shift
    if has_act:
        out = jnp.maximum(out, 0.0)
    o_ref[0] = out.astype(o_ref.dtype)


# --------------------------------------------------------------------------
# Two-pass fallback kernels (large feature maps)
# --------------------------------------------------------------------------
def _conv_stats_kernel(p_ref, w_ref, y_ref, s_ref):
    # p_ref : (1, tile_hw, K_pad) bf16 ; w_ref : (K_pad, C_pad) bf16
    # y_ref : (1, tile_hw, C_pad) bf16  conv output tile (intermediate)
    # s_ref : (1, 2, C_pad)       f32   resident per-sample [sum; sumsq]
    y = jnp.dot(p_ref[0], w_ref[...], preferred_element_type=jnp.float32)

    @pl.when(pl.program_id(1) == 0)
    def _init():
        s_ref[...] = jnp.zeros_like(s_ref)

    # TODO(synk): sum/sumsq variance can cancel when |mean| >> std; the fused
    #             path uses a two-pass variance instead.
    s_ref[0, 0:1, :] += jnp.sum(y, axis=0, keepdims=True)
    s_ref[0, 1:2, :] += jnp.sum(y * y, axis=0, keepdims=True)
    y_ref[0] = y.astype(y_ref.dtype)


def _scale_shift_act_kernel(y_ref, sc_ref, o_ref, *, has_act):
    # y_ref : (1, tile_hw, C_pad) bf16 ; sc_ref : (1, 2, C_pad) f32
    sc = sc_ref[0]
    y = y_ref[0].astype(jnp.float32) * sc[0:1, :] + sc[1:2, :]
    if has_act:
        y = jnp.maximum(y, 0.0)
    o_ref[0] = y.astype(o_ref.dtype)


def _conv_bias_act_kernel(p_ref, w_ref, b_ref, o_ref, *, has_act):
    # has_gn=False variant: conv + bias (+ ReLU), single pass.
    y = jnp.dot(p_ref[0], w_ref[...], preferred_element_type=jnp.float32)
    y = y + b_ref[...]
    if has_act:
        y = jnp.maximum(y, 0.0)
    o_ref[0] = y.astype(o_ref.dtype)


# --------------------------------------------------------------------------
# Wrapper
# --------------------------------------------------------------------------
def conv_gn_act_block(x, weight, bias, gamma, beta, *, stride=1, padding=1,
                      groups=1, dilation=1, has_gn=True, has_act=True,
                      num_groups=32, eps=1e-5, force_two_pass=False):
    """x: (N, Cin, H, W) NCHW. weight: (Cout, Cin, KH, KW). Returns NCHW."""
    assert groups == 1 and dilation == 1   # TODO(synk): unsupported variants
    N, C_in, H, W = x.shape
    C_out, _, KH, KW = weight.shape
    if has_gn:
        assert C_out % num_groups == 0
        assert bias is None                # nn.Conv2d(bias=False) when has_gn

    H_out = (H + 2 * padding - KH) // stride + 1
    W_out = (W + 2 * padding - KW) // stride + 1
    HW = H_out * W_out

    C_pad = _round_up(C_out, 128)          # lane-dense output stores
    K = KH * KW * C_in                     # folded contraction dim
    K_pad = _round_up(K, 16)               # bf16 sublane packing

    # Balanced spatial tiling: T near-equal tiles (amortizes per-step cost,
    # minimal padding waste).
    target_rows = int(min(2048, max(128, (4 << 20) // (2 * K_pad))))
    T = pl.cdiv(HW, target_rows)
    tile_hw = _round_up(pl.cdiv(HW, T), 16)
    HW_pad = T * tile_hw

    out_dtype = x.dtype
    out_itemsize = jnp.dtype(out_dtype).itemsize
    vmem32 = 32 * 1024 * 1024

    # --- im2col patches (wrapper), stored bf16 ------------------------------
    x_nhwc = jnp.transpose(x, (0, 2, 3, 1))
    x_sp = jnp.pad(x_nhwc,
                   ((0, 0), (padding, padding), (padding, padding), (0, 0)))
    cols = []
    for dy in range(KH):
        for dx in range(KW):
            cols.append(jax.lax.slice(
                x_sp, (0, dy, dx, 0),
                (N, dy + (H_out - 1) * stride + 1,
                 dx + (W_out - 1) * stride + 1, C_in),
                (1, stride, stride, 1)))
    patches = jnp.concatenate(cols, axis=-1).reshape(N, HW, K)
    patches = jnp.pad(patches, ((0, 0), (0, HW_pad - HW), (0, K_pad - K)))
    patches = patches.astype(jnp.bfloat16)

    # --- folded conv weight as one (K_pad, C_pad) MXU tile ------------------
    w_mat = jnp.transpose(weight, (2, 3, 1, 0)).reshape(K, C_out)
    w_mat = jnp.pad(w_mat, ((0, K_pad - K), (0, C_pad - C_out)))
    w_mat = w_mat.astype(jnp.bfloat16)

    if not has_gn:
        if bias is None:
            bias = jnp.zeros((C_out,), jnp.float32)
        bias_p = jnp.pad(bias.astype(jnp.float32),
                         (0, C_pad - C_out)).reshape(1, C_pad)
        out_flat = pl.pallas_call(
            functools.partial(_conv_bias_act_kernel, has_act=has_act),
            out_shape=jax.ShapeDtypeStruct((N, HW_pad, C_pad), out_dtype),
            grid=(N, T),
            in_specs=[
                pl.BlockSpec((1, tile_hw, K_pad), lambda b, t: (b, t, 0)),
                pl.BlockSpec((K_pad, C_pad), lambda b, t: (0, 0)),
                pl.BlockSpec((1, C_pad), lambda b, t: (0, 0)),
            ],
            out_specs=pl.BlockSpec((1, tile_hw, C_pad), lambda b, t: (b, t, 0)),
            compiler_params=pltpu.CompilerParams(
                dimension_semantics=("parallel", "parallel"),
                vmem_limit_bytes=vmem32),
        )(patches, w_mat, bias_p)
        out = out_flat[:, :HW, :C_out].reshape(N, H_out, W_out, C_out)
        return jnp.transpose(out, (0, 3, 1, 2))

    gsz = C_out // num_groups
    if gamma is None:
        gamma = jnp.ones((C_out,), jnp.float32)
    if beta is None:
        beta = jnp.zeros((C_out,), jnp.float32)

    # Fused-path gate: whole-sample conv output (+ temps) must fit in VMEM.
    fused_vmem = (2 * HW_pad * K_pad * 2              # patches, double-buffered
                  + 2 * K_pad * C_pad * 2             # weight
                  + 2 * C_pad * C_pad * 4             # group-indicator matrix
                  + 2 * HW_pad * C_pad * out_itemsize # output
                  + HW_pad * C_pad * 4                # conv-output scratch
                  + 4 * HW_pad * C_pad * 4)           # headroom for f32 temps
    use_fused = (not force_two_pass) and fused_vmem <= 28 * 1024 * 1024

    if use_fused:
        ch = np.arange(C_pad)
        same_group = (ch[:, None] // gsz) == (ch[None, :] // gsz)
        valid = ch < C_out
        a_mat = jnp.asarray(
            (same_group & valid[:, None] & valid[None, :]).astype(np.float32))
        g_mat = jnp.stack(
            [jnp.pad(gamma.astype(jnp.float32), (0, C_pad - C_out)),
             jnp.pad(beta.astype(jnp.float32), (0, C_pad - C_out))], axis=0)

        out_flat = pl.pallas_call(
            functools.partial(_fused_conv_gn_act_kernel, hw=HW,
                              inv_n=1.0 / float(gsz * HW), eps=float(eps),
                              has_act=has_act),
            out_shape=jax.ShapeDtypeStruct((N, HW_pad, C_pad), out_dtype),
            grid=(N,),
            in_specs=[
                pl.BlockSpec((1, HW_pad, K_pad), lambda b: (b, 0, 0)),
                pl.BlockSpec((K_pad, C_pad), lambda b: (0, 0)),
                pl.BlockSpec((C_pad, C_pad), lambda b: (0, 0)),
                pl.BlockSpec((2, C_pad), lambda b: (0, 0)),
            ],
            out_specs=pl.BlockSpec((1, HW_pad, C_pad), lambda b: (b, 0, 0)),
            scratch_shapes=[pltpu.VMEM((HW_pad, C_pad), jnp.float32)],
            compiler_params=pltpu.CompilerParams(
                dimension_semantics=("parallel",),
                vmem_limit_bytes=48 * 1024 * 1024),
        )(patches, w_mat, a_mat, g_mat)
    else:
        # ---- pass 1: conv tiles + per-channel sum / sumsq ------------------
        conv_out, stats = pl.pallas_call(
            _conv_stats_kernel,
            out_shape=[
                jax.ShapeDtypeStruct((N, HW_pad, C_pad), jnp.bfloat16),
                jax.ShapeDtypeStruct((N, 2, C_pad), jnp.float32),
            ],
            grid=(N, T),
            in_specs=[
                pl.BlockSpec((1, tile_hw, K_pad), lambda b, t: (b, t, 0)),
                pl.BlockSpec((K_pad, C_pad), lambda b, t: (0, 0)),
            ],
            out_specs=[
                pl.BlockSpec((1, tile_hw, C_pad), lambda b, t: (b, t, 0)),
                pl.BlockSpec((1, 2, C_pad), lambda b, t: (b, 0, 0)),
            ],
            compiler_params=pltpu.CompilerParams(
                dimension_semantics=("parallel", "arbitrary"),
                vmem_limit_bytes=vmem32),
        )(patches, w_mat)

        # ---- tiny channel->group reduction + fold gamma/beta (plain JAX) ---
        n = float(HW * gsz)
        sum_c = stats[:, 0, :C_out]
        sq_c = stats[:, 1, :C_out]
        mean_g = sum_c.reshape(N, num_groups, gsz).sum(-1) / n
        var_g = jnp.maximum(
            sq_c.reshape(N, num_groups, gsz).sum(-1) / n - mean_g * mean_g, 0.0)
        inv_g = jax.lax.rsqrt(var_g + eps)
        mean_c = jnp.repeat(mean_g, gsz, axis=1)
        inv_c = jnp.repeat(inv_g, gsz, axis=1)
        scale_c = inv_c * gamma[None, :].astype(jnp.float32)
        shift_c = beta[None, :].astype(jnp.float32) - mean_c * scale_c
        sc = jnp.stack(
            [jnp.pad(scale_c, ((0, 0), (0, C_pad - C_out))),
             jnp.pad(shift_c, ((0, 0), (0, C_pad - C_out)))], axis=1)

        # ---- pass 2: per-channel scale/shift + ReLU, written in x.dtype ----
        out_flat = pl.pallas_call(
            functools.partial(_scale_shift_act_kernel, has_act=has_act),
            out_shape=jax.ShapeDtypeStruct((N, HW_pad, C_pad), out_dtype),
            grid=(N, T),
            in_specs=[
                pl.BlockSpec((1, tile_hw, C_pad), lambda b, t: (b, t, 0)),
                pl.BlockSpec((1, 2, C_pad), lambda b, t: (b, 0, 0)),
            ],
            out_specs=pl.BlockSpec((1, tile_hw, C_pad), lambda b, t: (b, t, 0)),
            compiler_params=pltpu.CompilerParams(
                dimension_semantics=("parallel", "parallel"),
                vmem_limit_bytes=vmem32),
        )(conv_out, sc)

    out = out_flat[:, :HW, :C_out].reshape(N, H_out, W_out, C_out)
    return jnp.transpose(out, (0, 3, 1, 2))


def _reference_forward(x, weight, gamma, beta, *, stride, padding,
                       num_groups=32, eps=1e-5):
    """Pure-JAX reference matching PyTorch semantics (NCHW), full precision."""
    y = jax.lax.conv_general_dilated(
        x, weight, window_strides=(stride, stride),
        padding=[(padding, padding), (padding, padding)],
        dimension_numbers=("NCHW", "OIHW", "NCHW"),
        precision=jax.lax.Precision.HIGHEST)
    N, C, H, W = y.shape
    yg = y.reshape(N, num_groups, (C // num_groups) * H * W)
    mean = jnp.mean(yg, axis=-1, keepdims=True)
    var = jnp.mean((yg - mean) ** 2, axis=-1, keepdims=True)
    yg = (yg - mean) / jnp.sqrt(var + eps)
    y = yg.reshape(N, C, H, W)
    y = y * gamma[None, :, None, None] + beta[None, :, None, None]
    return jnp.maximum(y, 0.0)


if __name__ == "__main__":
    # ConvGnActBlock(inplanes=4, planes=64, kernel_size=3, stride=1, padding=1)
    N, C_in, H, W = 2, 4, 16, 16
    C_out, Ksz, stride, padding = 64, 3, 1, 1

    key = jax.random.PRNGKey(0)
    k1, k2, k3, k4 = jax.random.split(key, 4)
    x = jax.random.normal(k1, (N, C_in, H, W), jnp.float32)
    weight = 0.1 * jax.random.normal(k2, (C_out, C_in, Ksz, Ksz), jnp.float32)
    gamma = 1.0 + 0.1 * jax.random.normal(k3, (C_out,), jnp.float32)
    beta = 0.1 * jax.random.normal(k4, (C_out,), jnp.float32)

    ref = jax.block_until_ready(_reference_forward(
        x, weight, gamma, beta, stride=stride, padding=padding))

    # Fused single-pass path (fits easily in VMEM at these sizes).
    fused_fwd = jax.jit(functools.partial(
        conv_gn_act_block, stride=stride, padding=padding,
        has_gn=True, has_act=True, num_groups=32, eps=1e-5))
    out_fused = jax.block_until_ready(fused_fwd(x, weight, None, gamma, beta))
    assert out_fused.shape == (N, C_out, H, W), out_fused.shape
    # Tolerance covers the bf16 MXU operand rounding vs the f32 reference.
    if not np.allclose(np.asarray(out_fused), np.asarray(ref),
                       atol=5e-2, rtol=5e-2):
        raise AssertionError("fused Pallas kernel does not match reference")

    # Two-pass fallback path (forced, to exercise the large-feature-map code).
    twopass_fwd = jax.jit(functools.partial(
        conv_gn_act_block, stride=stride, padding=padding,
        has_gn=True, has_act=True, num_groups=32, eps=1e-5,
        force_two_pass=True))
    out_2p = jax.block_until_ready(twopass_fwd(x, weight, None, gamma, beta))
    assert out_2p.shape == (N, C_out, H, W), out_2p.shape
    if not np.allclose(np.asarray(out_2p), np.asarray(ref),
                       atol=5e-2, rtol=5e-2):
        raise AssertionError("two-pass Pallas kernel does not match reference")

    print("KERNEL_OK")
</pallas_src>

<mosaic_0001>
module attributes {stable_mosaic.version = 11 : i64} {
  func.func @_fused_conv_gn_act_kernel(%arg0: i32, %arg1: memref<1x256x48xbf16, #tpu.memory_space<vmem>>, %arg2: memref<48x128xbf16, #tpu.memory_space<vmem>>, %arg3: memref<128x128xf32, #tpu.memory_space<vmem>>, %arg4: memref<2x128xf32, #tpu.memory_space<vmem>>, %arg5: memref<1x256x128xf32, #tpu.memory_space<vmem>>, %arg6: memref<256x128xf32, #tpu.memory_space<vmem>>) attributes {dimension_semantics = [#tpu.dimension_semantics<parallel>], iteration_bounds = array<i64: 2>, scalar_prefetch = 0 : i64, scratch_operands = 1 : i64, tpu.core_type = #tpu.core_type<tc>, window_params = [{transform_indices = @transform_0, window_bounds = array<i64: 1, 256, 48>}, {pipeline_mode = #tpu.pipeline_mode<synchronous>, transform_indices = @transform_1, window_bounds = array<i64: 48, 128>}, {pipeline_mode = #tpu.pipeline_mode<synchronous>, transform_indices = @transform_2, window_bounds = array<i64: 128, 128>}, {pipeline_mode = #tpu.pipeline_mode<synchronous>, transform_indices = @transform_3, window_bounds = array<i64: 2, 128>}, {transform_indices = @transform_4, window_bounds = array<i64: 1, 256, 128>}]} {
    %c0 = arith.constant 0 : index
    %c0_0 = arith.constant 0 : index
    %c0_1 = arith.constant 0 : index
    %0 = vector.load %arg1[%c0, %c0_0, %c0_1] : memref<1x256x48xbf16, #tpu.memory_space<vmem>>, vector<1x256x48xbf16>
    %1 = vector.shape_cast %0 : vector<1x256x48xbf16> to vector<256x48xbf16>
    %c0_2 = arith.constant 0 : index
    %c0_3 = arith.constant 0 : index
    %2 = vector.load %arg2[%c0_2, %c0_3] : memref<48x128xbf16, #tpu.memory_space<vmem>>, vector<48x128xbf16>
    %cst = arith.constant dense<0.000000e+00> : vector<256x128xf32>
    %3 = tpu.matmul %1, %2, %cst {dimension_numbers = #tpu.dot_dimension_numbers<[1], [0], [0], [1], [0, 0, 1, 1], [], []>} : vector<256x48xbf16>, vector<48x128xbf16>, vector<256x128xf32> -> vector<256x128xf32>
    %c0_4 = arith.constant 0 : index
    %c0_5 = arith.constant 0 : index
    %4 = vector.load %arg6[%c0_4, %c0_5] : memref<256x128xf32, #tpu.memory_space<vmem>>, vector<256x128xf32>
    tpu.vector_store %arg6[%c0_4, %c0_5], %3 {strides = array<i32>} : memref<256x128xf32, #tpu.memory_space<vmem>>, vector<256x128xf32>,
    %c0_6 = arith.constant 0 : index
    %c0_7 = arith.constant 0 : index
    %5 = vector.load %arg6[%c0_6, %c0_7] : memref<256x128xf32, #tpu.memory_space<vmem>>, vector<256x128xf32>
    %c0_8 = arith.constant 0 : index
    %c0_9 = arith.constant 0 : index
    %6 = vector.load %arg3[%c0_8, %c0_9] : memref<128x128xf32, #tpu.memory_space<vmem>>, vector<128x128xf32>
    %cst_10 = arith.constant dense<0.000000e+00> : vector<256x128xf32>
    %7 = tpu.matmul %5, %6, %cst_10 {dimension_numbers = #tpu.dot_dimension_numbers<[1], [0], [0], [1], [0, 0, 1, 1], [], []>} : vector<256x128xf32>, vector<128x128xf32>, vector<256x128xf32> -> vector<256x128xf32>
    %cst_11 = arith.constant dense<0.000000e+00> : vector<128xf32>
    %8 = vector.multi_reduction <add>, %7, %cst_11 [0] : vector<256x128xf32> to vector<128xf32>
    %9 = vector.shape_cast %8 : vector<128xf32> to vector<1x128xf32>
    %cst_12 = arith.constant 0.001953125 : f32
    %10 = vector.broadcast %cst_12 : f32 to vector<1x128xf32>
    %11 = arith.mulf %9, %10 : vector<1x128xf32>
    %c0_13 = arith.constant 0 : index
    %c0_14 = arith.constant 0 : index
    %12 = vector.load %arg6[%c0_13, %c0_14] : memref<256x128xf32, #tpu.memory_space<vmem>>, vector<256x128xf32>
    %13 = vector.broadcast %11 : vector<1x128xf32> to vector<256x128xf32>
    %14 = arith.subf %12, %13 : vector<256x128xf32>
    %15 = arith.mulf %14, %14 : vector<256x128xf32>
    %c0_15 = arith.constant 0 : index
    %c0_16 = arith.constant 0 : index
    %16 = vector.load %arg3[%c0_15, %c0_16] : memref<128x128xf32, #tpu.memory_space<vmem>>, vector<128x128xf32>
    %cst_17 = arith.constant dense<0.000000e+00> : vector<256x128xf32>
    %17 = tpu.matmul %15, %16, %cst_17 {dimension_numbers = #tpu.dot_dimension_numbers<[1], [0], [0], [1], [0, 0, 1, 1], [], []>} : vector<256x128xf32>, vector<128x128xf32>, vector<256x128xf32> -> vector<256x128xf32>
    %cst_18 = arith.constant dense<0.000000e+00> : vector<128xf32>
    %18 = vector.multi_reduction <add>, %17, %cst_18 [0] : vector<256x128xf32> to vector<128xf32>
    %19 = vector.shape_cast %18 : vector<128xf32> to vector<1x128xf32>
    %cst_19 = arith.constant 0.001953125 : f32
    %20 = vector.broadcast %cst_19 : f32 to vector<1x128xf32>
    %21 = arith.mulf %19, %20 : vector<1x128xf32>
    %c0_20 = arith.constant 0 : index
    %c0_21 = arith.constant 0 : index
    %22 = vector.load %arg4[%c0_20, %c0_21] : memref<2x128xf32, #tpu.memory_space<vmem>>, vector<1x128xf32>
    %cst_22 = arith.constant 9.99999974E-6 : f32
    %23 = vector.broadcast %cst_22 : f32 to vector<1x128xf32>
    %24 = arith.addf %21, %23 : vector<1x128xf32>
    %25 = math.rsqrt %24 : vector<1x128xf32>
    %26 = arith.mulf %22, %25 : vector<1x128xf32>
    %c1 = arith.constant 1 : index
    %c0_23 = arith.constant 0 : index
    %27 = vector.load %arg4[%c1, %c0_23] : memref<2x128xf32, #tpu.memory_space<vmem>>, vector<1x128xf32>
    %28 = arith.mulf %11, %26 : vector<1x128xf32>
    %29 = arith.subf %27, %28 : vector<1x128xf32>
    %c0_24 = arith.constant 0 : index
    %c0_25 = arith.constant 0 : index
    %30 = vector.load %arg6[%c0_24, %c0_25] : memref<256x128xf32, #tpu.memory_space<vmem>>, vector<256x128xf32>
    %31 = vector.broadcast %26 : vector<1x128xf32> to vector<256x128xf32>
    %32 = arith.mulf %30, %31 : vector<256x128xf32>
    %33 = vector.broadcast %29 : vector<1x128xf32> to vector<256x128xf32>
    %34 = arith.addf %32, %33 : vector<256x128xf32>
    %cst_26 = arith.constant 0.000000e+00 : f32
    %35 = vector.broadcast %cst_26 : f32 to vector<256x128xf32>
    %36 = arith.maximumf %34, %35 : vector<256x128xf32>
    %c0_27 = arith.constant 0 : index
    %c0_28 = arith.constant 0 : index
    %c0_29 = arith.constant 0 : index
    %37 = vector.load %arg5[%c0_27, %c0_28, %c0_29] : memref<1x256x128xf32, #tpu.memory_space<vmem>>, vector<1x256x128xf32>
    %38 = vector.shape_cast %37 : vector<1x256x128xf32> to vector<256x128xf32>
    %39 = vector.shape_cast %36 : vector<256x128xf32> to vector<1x256x128xf32>
    tpu.vector_store %arg5[%c0_27, %c0_28, %c0_29], %39 {strides = array<i32>} : memref<1x256x128xf32, #tpu.memory_space<vmem>>, vector<1x256x128xf32>,
    return
  }
  func.func @transform_0(%arg0: i32) -> (i32, i32, i32) {
    %c0_i32 = arith.constant 0 : i32
    %c0_i32_0 = arith.constant 0 : i32
    %c0_i32_1 = arith.constant 0 : i32
    return %arg0, %c0_i32, %c0_i32_0 : i32, i32, i32
  }
  func.func @transform_1(%arg0: i32) -> (i32, i32) {
    %c0_i32 = arith.constant 0 : i32
    %c0_i32_0 = arith.constant 0 : i32
    %c0_i32_1 = arith.constant 0 : i32
    return %c0_i32, %c0_i32_0 : i32, i32
  }
  func.func @transform_2(%arg0: i32) -> (i32, i32) {
    %c0_i32 = arith.constant 0 : i32
    %c0_i32_0 = arith.constant 0 : i32
    %c0_i32_1 = arith.constant 0 : i32
    return %c0_i32, %c0_i32_0 : i32, i32
  }
  func.func @transform_3(%arg0: i32) -> (i32, i32) {
    %c0_i32 = arith.constant 0 : i32
    %c0_i32_0 = arith.constant 0 : i32
    %c0_i32_1 = arith.constant 0 : i32
    return %c0_i32, %c0_i32_0 : i32, i32
  }
  func.func @transform_4(%arg0: i32) -> (i32, i32, i32) {
    %c0_i32 = arith.constant 0 : i32
    %c0_i32_0 = arith.constant 0 : i32
    %c0_i32_1 = arith.constant 0 : i32
    return %arg0, %c0_i32, %c0_i32_0 : i32, i32, i32
  }
}

</mosaic_0001>

<bundles_post_ra>
// kernel: conv_gn_act_block.1
= control target key start
LH: loop header
LB: loop body
LE: loop exit
PB: predicated region body
PF: predicated region fallthrough
CT: control target
= control target key end

     0   :  { %9 = vsyncpa [#allocation4], 0  ;;  %s2494_s0 = inlined_call_operand.vmem [shape: bf16[2,256,48], index: 0, kind: input, shape index: {}]   ;;  %s2495_s1 = inlined_call_operand.vmem [shape: bf16[48,128], index: 1, kind: input, shape index: {}]   ;;  %s2496_s2 = inlined_call_operand.vmem [shape: f32[128,128], index: 2, kind: input, shape index: {}]   ;;  %s2497_s3 = inlined_call_operand.vmem [shape: f32[2,128], index: 3, kind: input, shape index: {}]   ;;  %s2498_s4 = inlined_call_operand.hbm [shape: f32[2,256,128], index: 4, kind: output, shape index: {}]  }
   0x1   :  { %11 = vsyncpa [#allocation4 + $0x1], 0  ;;  %s2018_s15 = smov 0   ;;  %s2020_s16 = smov 0  }
   0x2   :  { %s2022_s17 = smov 0   ;;  %s2024_s18 = smov 0  }
   0x3 LB: > { %s2039_s19 = sadd.s32 4294967295, %s1988_s18   ;;  %s1432_s20 = sadd.s32 4294967294, %s1988_s18   ;;  %s1988_s18 = sphi %s2024_s18, %s2504_s18   ;;  %s1984_s17 = sphi %s2022_s17, %s2503_s17   ;;  %s1980_s16 = sphi %s2020_s16, %s2502_s16   ;;  %s1976_s15 = sphi %s2018_s15, %s2501_s15  }
   0x4   : > { %s2043_s21 = sadd.s32 1, %s1988_s18   ;;  %s113_s22 = sadd.s32 1, %s1984_s17 }
   0x5   : > { %s110_s23 = ssub.s32 %s1988_s18, %s2043_s21  ;;  %p123_p0 = scmp.ne.s32.totalorder %s1984_s17, %s1980_s16 }
   0x6   : > { %p111_p1 = scmp.eq.s32.totalorder %s110_s23, 0  ;;  %p124_p2 = scmp.eq.s32.totalorder %s2039_s19, 1 }
   0x7   : > { %p129_p3 = scmp.ne.s32.totalorder %s1980_s16, %s1976_s15  ;;  %p130_p4 = scmp.eq.s32.totalorder %s1432_s20, 1 }
   0x8   : > { %s2054_s24 = scalar_select %p111_p1, %s1984_s17, %s113_s22  }
   0x9   : > { %p2056_p5 = por %p124_p2, %p123_p0  ;;  %p2060_p6 = por %p130_p4, %p129_p3 }
   0xa   : > { %p1435_p7 = scmp.ge.s32.totalorder %s1988_s18, 1  ;;  %p165_p8 = scmp.lt.s32.totalorder %s1988_s18, 3 }
   0xc   : > { %p166_p9 = pnand %p1435_p7, %p165_p8 }
   0xd   : > { %v1905_v0 = vld [vmem:[%s2495_s1] sm:$0xff] (!%p166_p9)   ;;  %p191_p10 = scmp.lt.s32.totalorder (!%p166_p9), %s2039_s19, 1  ;;  %v1906_v1 = vld [vmem:[%s2495_s1 + $0x8] sm:$0xff] (!%p166_p9)   ;;  %v1907_v2 = vld [vmem:[%s2495_s1 + $0x10] sm:$0xff] (!%p166_p9)   ;;  %vm333_vm0 = vcmask (!%p166_p9), 392192   ;;  %s188_s20 = sand.u32 (!%p166_p9), 1, %s1980_s16  }
   0xe   : > { %169 = sbr.rel (%p166_p9) target bundleno = 894 (0x37e), region = 36  ;;  %1596 = vmatprep.subr.bf16.mxu0 (!%p166_p9), %v1905_v0  ;;  %1858 = vmatprep.subr.bf16.mxu1 (!%p166_p9), %v1905_v0  ;;  %v607_v3 = vld [vmem:[%s2496_s2] sm:$0xff] (!%p166_p9)  ;;  %v608_v4 = vld [vmem:[%s2496_s2 + $0x8] sm:$0xff] (!%p166_p9)  ;;  %v609_v7 = vld [vmem:[%s2496_s2 + $0x10] sm:$0xff] (!%p166_p9)  ;;  %s1436_s22 = sshll.u32 (!%p166_p9), %s188_s20, 8 }
   0xf   : > { %1597 = vmatpush3.bf16.msra.mxu0 (!%p166_p9), %v1905_v0  ;;  %1861 = vmatpush3.bf16.msra.mxu1 (!%p166_p9), %v1905_v0  ;;  %v1794_v6 = vpack.c.bf16 (!%p166_p9), %v608_v4, %v607_v3  ;;  %v610_v8 = vld [vmem:[%s2496_s2 + $0x18] sm:$0xff] (!%p166_p9)  ;;  %v611_v11 = vld [vmem:[%s2496_s2 + $0x20] sm:$0xff] (!%p166_p9)  ;;  %v612_v12 = vld [vmem:[%s2496_s2 + $0x28] sm:$0xff] (!%p166_p9)  ;;  %s2394_s23 = scalar_lea.vmem (!%p166_p9), [#allocation3], %s1436_s22  ;;  %s1480_s27 = sshll.u32 (!%p166_p9), %s2039_s19, 12 }
  0x10   : > { %1598 = vmatprep.subr.bf16.mxu0 (!%p166_p9), %v1906_v1  ;;  %1859 = vmatprep.subr.bf16.mxu1 (!%p166_p9), %v1906_v1  ;;  %v1798_v14 = vpack.c.bf16 (!%p166_p9), %v610_v8, %v609_v7  ;;  %v1802_v18 = vpack.c.bf16 (!%p166_p9), %v612_v12, %v611_v11  ;;  %v613_v19 = vld [vmem:[%s2496_s2 + $0x30] sm:$0xff] (!%p166_p9)  ;;  %v614_v21 = vld [vmem:[%s2496_s2 + $0x38] sm:$0xff] (!%p166_p9)  ;;  %v615_v25 = vld [vmem:[%s2496_s2 + $0x40] sm:$0xff] (!%p166_p9)  ;;  %s1370_s28 = sshll.u32 (!%p166_p9), %s2394_s23, 4  ;;  %s2435_s30 = scalar_lea.hbm (!%p166_p9), %s2498_s4, %s1480_s27  ;;  %s2437_s28 = int_to_ptr.vmem [resolvable:$true] %s1370_s28 }
  0x11   : > { %v1806_v24 = vpack.c.bf16 (!%p166_p9), %v614_v21, %v613_v19  ;;  %v616_v26 = vld [vmem:[%s2496_s2 + $0x48] sm:$0xff] (!%p166_p9)  ;;  %v617_v30 = vld [vmem:[%s2496_s2 + $0x50] sm:$0xff] (!%p166_p9)  ;;  %v618_v31 = vld [vmem:[%s2496_s2 + $0x58] sm:$0xff] (!%p166_p9)  ;;  %s1926_s6 = scalar_lea.vmem (!%p166_p9), %s2437_s28, 4096  ;;  %s1990_s7 = smov (!%p166_p9), [#allocation3]  }
  0x12   : > { %v1810_v29 = vpack.c.bf16 (!%p166_p9), %v616_v26, %v615_v25  ;;  %v1814_v34 = vpack.c.bf16 (!%p166_p9), %v618_v31, %v617_v30  ;;  %v619_v35 = vld [vmem:[%s2496_s2 + $0x60] sm:$0xff] (!%p166_p9)  ;;  %v620_v36 = vld [vmem:[%s2496_s2 + $0x68] sm:$0xff] (!%p166_p9)  ;;  %v621_v39 = vld [vmem:[%s2496_s2 + $0x70] sm:$0xff] (!%p166_p9)  ;;  %p1927_p11 = scmp.ne.s32.totalorder (!%p166_p9), %s2437_s28, %s1926_s6 }
  0x13   : > { %1599 = vmatpush3.bf16.msra.mxu0 (!%p166_p9), %v1906_v1  ;;  %1862 = vmatpush3.bf16.msra.mxu1 (!%p166_p9), %v1906_v1  ;;  %v1818_v38 = vpack.c.bf16 (!%p166_p9), %v620_v36, %v619_v35  ;;  %v622_v40 = vld [vmem:[%s2496_s2 + $0x78] sm:$0xff] (!%p166_p9) }
  0x14   : > { %1600 = vmatprep.subr.bf16.mxu0 (!%p166_p9), %v1907_v2  ;;  %1860 = vmatprep.subr.bf16.mxu1 (!%p166_p9), %v1907_v2  ;;  %v1822_v42 = vpack.c.bf16 (!%p166_p9), %v622_v40, %v621_v39  ;;  %p1928_p12 = pnand (!%p166_p9), %p1927_p11, %p2056_p5 }
  0x15   : > { %s192_s5 = scalar_select %p191_p10, %s2039_s19, 1 }
  0x16   : > { %p1929_p13 = pneg %p1928_p12 }
  0x17   : > { %s1479_s8 = sshll.u32 %s192_s5, 7  ;;  %1601 = vmatpush3.bf16.msra.mxu0 %v1907_v2  ;;  %1863 = vmatpush3.bf16.msra.mxu1 %v1907_v2  ;;  %s2453_s5 = scalar_lea.sflag [#allocation4], %s188_s20 }
  0x18   : > { %s2080_s11 = scalar_lea.vmem %s2494_s0, %s1479_s8  ;;  %1795 = vmatprep.subr.bf16.mxu1 %v1794_v6  ;;  %1827 = vmatprep.subr.bf16.mxu0 %v1794_v6  ;;  %s1930_s8 = sshll.u32 %s1990_s7, 4  ;;  %s1931_s8 = int_to_ptr.vmem [resolvable:$false] %s1930_s8 }
  0x19   : > { %v1908_v5 = vld [vmem:[%s2080_s11] sm:$0xff]   ;;  %v1909_v9 = vld [vmem:[%s2080_s11 + $0x8] sm:$0xff]   ;;  %v1910_v10 = vld [vmem:[%s2080_s11 + $0x10] sm:$0xff]   ;;  %s1932_s9 = scalar_lea.vmem %s1931_s8, 8192  ;;  %p1933_p0 = scmp.lt.s32.totalorder %s2437_s28, %s1931_s8 }
  0x1a   : > { %1602 = vmatprep.mubr.msk.bf16.mxu0 %vm333_vm0, %v1908_v5  ;;  %v1916_v13 = vld [vmem:[%s2080_s11 + $0x40] sm:$0xff]   ;;  %v1917_v15 = vld [vmem:[%s2080_s11 + $0x48] sm:$0xff]   ;;  %v1918_v16 = vld [vmem:[%s2080_s11 + $0x50] sm:$0xff]   ;;  %p1934_p1 = scmp.lt.s32.totalorder %s1932_s9, %s1926_s6 }
  0x1b   : > { %1603 = vmatmul.mubr.msk.bf16.vlgmr.msra.gmra.mrb[0].mxu0 %vm333_vm0, %v1909_v9  ;;  %1618 = vmatprep.mubr.msk.bf16.mxu1 %vm333_vm0, %v1916_v13  ;;  %v1911_v17 = vld [vmem:[%s2080_s11 + $0x18] sm:$0xff]   ;;  %v1912_v20 = vld [vmem:[%s2080_s11 + $0x20] sm:$0xff]   ;;  %v1913_v27 = vld [vmem:[%s2080_s11 + $0x28] sm:$0xff]  }
  0x1c   : > { %1606 = vmatprep.mubr.msk.bf16.mxu0 %vm333_vm0, %v1910_v10  ;;  %1829 = vmatpush3.bf16.msra.mxu0 %v1794_v6  ;;  %v1919_v22 = vld [vmem:[%s2080_s11 + $0x58] sm:$0xff]   ;;  %v1920_v23 = vld [vmem:[%s2080_s11 + $0x60] sm:$0xff]   ;;  %v1914_v28 = vld [vmem:[%s2080_s11 + $0x30] sm:$0xff]   ;;  %p1935_p2 = por %p1934_p1, %p1933_p0 }
  0x1d   : > { %1831 = vmatprep.subr.bf16.mxu0 %v1798_v14  ;;  %1619 = vmatmul.mubr.msk.bf16.vlgmr.msra.gmra.mrb[0].mxu1 %vm333_vm0, %v1917_v15  ;;  %v1921_v32 = vld [vmem:[%s2080_s11 + $0x68] sm:$0xff]   ;;  %v1922_v33 = vld [vmem:[%s2080_s11 + $0x70] sm:$0xff]   ;;  %v1915_v37 = vld [vmem:[%s2080_s11 + $0x38] sm:$0xff]  }
  0x1e   : > { %1622 = vmatprep.mubr.msk.bf16.mxu1 %vm333_vm0, %v1918_v16  ;;  %1797 = vmatpush3.bf16.msra.mxu1 %v1794_v6  ;;  %v1923_v41 = vld [vmem:[%s2080_s11 + $0x78] sm:$0xff]   ;;  %p1936_p3 = pnand %p1935_p2, %p1929_p13 }
  0x1f   : > { %1799 = vmatprep.subr.bf16.mxu1 %v1798_v14 }
  0x20   : > { %1833 = vmatpush3.bf16.msra.mxu0 %v1798_v14 }
  0x21   : > { %1835 = vmatprep.subr.bf16.mxu0 %v1802_v18 }
  0x22   : > { %1801 = vmatpush3.bf16.msra.mxu1 %v1798_v14 }
  0x23   : > { %1607 = vmatmul.mubr.msk.bf16.gmra.mrb[4].mxu0 %vm333_vm0, %v1911_v17  ;;  %1803 = vmatprep.subr.bf16.mxu1 %v1802_v18 }
  0x24   : > { %1610 = vmatprep.mubr.msk.bf16.mxu0 %vm333_vm0, %v1912_v20  ;;  %1837 = vmatpush3.bf16.msra.mxu0 %v1802_v18 }
  0x25   : > { %1623 = vmatmul.mubr.msk.bf16.gmra.mrb[4].mxu1 %vm333_vm0, %v1919_v22  ;;  %1839 = vmatprep.subr.bf16.mxu0 %v1806_v24 }
  0x26   : > { %1626 = vmatprep.mubr.msk.bf16.mxu1 %vm333_vm0, %v1920_v23  ;;  %1805 = vmatpush3.bf16.msra.mxu1 %v1802_v18 }
  0x27   : > { %1807 = vmatprep.subr.bf16.mxu1 %v1806_v24 }
  0x28   : > { %1841 = vmatpush3.bf16.msra.mxu0 %v1806_v24 }
  0x29   : > { %1843 = vmatprep.subr.bf16.mxu0 %v1810_v29 }
  0x2a   : > { %1809 = vmatpush3.bf16.msra.mxu1 %v1806_v24 }
  0x2b   : > { %1611 = vmatmul.mubr.msk.bf16.gmra.mrb[8].mxu0 %vm333_vm0, %v1913_v27  ;;  %1811 = vmatprep.subr.bf16.mxu1 %v1810_v29 }
  0x2c   : > { %1614 = vmatprep.mubr.msk.bf16.mxu0 %vm333_vm0, %v1914_v28  ;;  %1845 = vmatpush3.bf16.msra.mxu0 %v1810_v29 }
  0x2d   : > { %1627 = vmatmul.mubr.msk.bf16.gmra.mrb[8].mxu1 %vm333_vm0, %v1921_v32  ;;  %1847 = vmatprep.subr.bf16.mxu0 %v1814_v34 }
  0x2e   : > { %1630 = vmatprep.mubr.msk.bf16.mxu1 %vm333_vm0, %v1922_v33  ;;  %1813 = vmatpush3.bf16.msra.mxu1 %v1810_v29 }
  0x2f   : > { %1815 = vmatprep.subr.bf16.mxu1 %v1814_v34 }
  0x30   : > { %1849 = vmatpush3.bf16.msra.mxu0 %v1814_v34 }
  0x31   : > { %1851 = vmatprep.subr.bf16.mxu0 %v1818_v38 }
  0x32   : > { %1817 = vmatpush3.bf16.msra.mxu1 %v1814_v34 }
  0x33   : > { %1615 = vmatmul.mubr.msk.bf16.gmra.mrb[12].mxu0 %vm333_vm0, %v1915_v37  ;;  %1819 = vmatprep.subr.bf16.mxu1 %v1818_v38 }
  0x34   : > { %1853 = vmatpush3.bf16.msra.mxu0 %v1818_v38 }
  0x35   : > { %1631 = vmatmul.mubr.msk.bf16.gmra.mrb[12].mxu1 %vm333_vm0, %v1923_v41  ;;  %1855 = vmatprep.subr.bf16.mxu0 %v1822_v42 }
  0x36   : > { %1821 = vmatpush3.bf16.msra.mxu1 %v1818_v38 }
  0x37   : > { %1823 = vmatprep.subr.bf16.mxu1 %v1822_v42 }
  0x38   : > { %1857 = vmatpush3.bf16.msra.mxu0 %v1822_v42 }
  0x3a   : > { %1825 = vmatpush3.bf16.msra.mxu1 %v1822_v42 }
  0xee   : > { %v2162_v43 = vpop.f32.mrb[0].mxu0 }
  0xef   : > { %v2164_v44 = vpop.f32.mrb[1].mxu0 }
  0xf0   : > { %v2166_v45 = vpop.f32.mrb[2].mxu0  ;;  %1666 = vmatprep.mubr.f32.mxu1 %v2164_v44  ;;  %v2171_v47 = vpop.f32.mrb[0].mxu1 }
  0xf1   : > { %v2169_v46 = vpop.f32.mrb[3].mxu0  ;;  %v2174_v48 = vpop.f32.mrb[1].mxu1 }
  0xf2   : > { %1667 = vmatmul.mubr.f32.vlgmr.msra.gmra.mrb[16].mxu1 %v2169_v46  ;;  %v2177_v49 = vpop.f32.mrb[2].mxu1 }
  0xf3   : > { %1669 = vmatprep.mubr.f32.mxu1 %v2162_v43  ;;  %v2179_v50 = vpop.f32.mrb[3].mxu1 }
  0xf6   : > { %v2181_v51 = vpop.f32.mrb[4].mxu0  ;;  %1670 = vmatmul.mubr.f32.gmra.mrb[18].mxu1 %v2166_v45 }
  0xf7   : > { %v2184_v52 = vpop.f32.mrb[5].mxu0 }
  0xf8   : > { %v2186_v53 = vpop.f32.mrb[6].mxu0  ;;  %1672 = vmatprep.mubr.f32.mxu1 %v2184_v52  ;;  %v2191_v55 = vpop.f32.mrb[4].mxu1 }
  0xf9   : > { %v2189_v54 = vpop.f32.mrb[7].mxu0  ;;  %v2194_v56 = vpop.f32.mrb[5].mxu1 }
  0xfa   : > { %1673 = vmatmul.mubr.f32.gmra.mrb[20].mxu1 %v2189_v54  ;;  %v2197_v57 = vpop.f32.mrb[6].mxu1 }
  0xfb   : > { %1675 = vmatprep.mubr.f32.mxu1 %v2181_v51  ;;  %v2199_v58 = vpop.f32.mrb[7].mxu1 }
  0xfe   : > { %v2201_v59 = vpop.f32.mrb[8].mxu0  ;;  %1676 = vmatmul.mubr.f32.gmra.mrb[22].mxu1 %v2186_v53 }
  0xff   : > { %v2204_v60 = vpop.f32.mrb[9].mxu0 }
 0x100   : > { %v2206_v61 = vpop.f32.mrb[10].mxu0  ;;  %1678 = vmatprep.mubr.f32.mxu1 %v2204_v60  ;;  %v2211_v63 = vpop.f32.mrb[8].mxu1 }
 0x101   : > { %v2209_v62 = vpop.f32.mrb[11].mxu0  ;;  %v2214_v0 = vpop.f32.mrb[9].mxu1 }
 0x102   : > { %1679 = vmatmul.mubr.f32.gmra.mrb[24].mxu1 %v2209_v62  ;;  %v2217_v1 = vpop.f32.mrb[10].mxu1 }
 0x103   : > { %1681 = vmatprep.mubr.f32.mxu1 %v2201_v59  ;;  %v2219_v2 = vpop.f32.mrb[11].mxu1 }
 0x106   : > { %v2221_v3 = vpop.f32.mrb[12].mxu0  ;;  %1682 = vmatmul.mubr.f32.gmra.mrb[26].mxu1 %v2206_v61 }
 0x107   : > { %v2224_v4 = vpop.f32.mrb[13].mxu0 }
 0x108   : > { %v2226_v5 = vpop.f32.mrb[14].mxu0  ;;  %1684 = vmatprep.mubr.f32.mxu1 %v2224_v4  ;;  %v2231_v7 = vpop.f32.mrb[12].mxu1 }
 0x109   : > { %v2229_v6 = vpop.f32.mrb[15].mxu0  ;;  %v2234_v8 = vpop.f32.mrb[13].mxu1 }
 0x10a   : > { %1685 = vmatmul.mubr.f32.gmra.mrb[28].mxu1 %v2229_v6  ;;  %v2237_v9 = vpop.f32.mrb[14].mxu1 }
 0x10b   : > { %1687 = vmatprep.mubr.f32.mxu1 %v2221_v3  ;;  %v2239_v10 = vpop.f32.mrb[15].mxu1 }
 0x10e   : > { %1688 = vmatmul.mubr.f32.gmra.mrb[30].mxu1 %v2226_v5 }
 0x10f   : > { %1690 = vmatprep.mubr.f32.mxu1 %v2174_v48 }
 0x112   : > { %1691 = vmatmul.mubr.f32.gmra.mrb[32].mxu1 %v2179_v50 }
 0x113   : > { %1693 = vmatprep.mubr.f32.mxu1 %v2171_v47 }
 0x116   : > { %1694 = vmatmul.mubr.f32.gmra.mrb[34].mxu1 %v2177_v49 }
 0x117   : > { %1696 = vmatprep.mubr.f32.mxu1 %v2194_v56 }
 0x11a   : > { %1697 = vmatmul.mubr.f32.gmra.mrb[36].mxu1 %v2199_v58 }
 0x11b   : > { %1699 = vmatprep.mubr.f32.mxu1 %v2191_v55 }
 0x11e   : > { %1700 = vmatmul.mubr.f32.gmra.mrb[38].mxu1 %v2197_v57 }
 0x11f   : > { %1702 = vmatprep.mubr.f32.mxu1 %v2214_v0 }
 0x122   : > { %1703 = vmatmul.mubr.f32.gmra.mrb[40].mxu1 %v2219_v2 }
 0x123   : > { %1705 = vmatprep.mubr.f32.mxu1 %v2211_v63 }
 0x126   : > { %1706 = vmatmul.mubr.f32.gmra.mrb[42].mxu1 %v2217_v1 }
 0x127   : > { %1708 = vmatprep.mubr.f32.mxu1 %v2234_v8 }
 0x12a   : > { %1709 = vmatmul.mubr.f32.gmra.mrb[44].mxu1 %v2239_v10 }
 0x12b   : > { %1711 = vmatprep.mubr.f32.mxu1 %v2231_v7 }
 0x12e   : > { %1712 = vmatmul.mubr.f32.gmra.mrb[46].mxu1 %v2237_v9 }
 0x1c5   : > { %v1668_v11 = vpop.f32.mrb[16].mxu1 }
 0x1c6   : > { %v689_v12 = vpop.f32.mrb[17].mxu1 }
 0x1c7   : > { %v848_v13 = vadd.f32 %v1668_v11, %v689_v12 }
 0x1c9   : > { %v1671_v14 = vpop.f32.mrb[18].mxu1 }
 0x1ca   : > { %v699_v15 = vpop.f32.mrb[19].mxu1 }
 0x1cb   : > { %v849_v16 = vadd.f32 %v848_v13, %v699_v15 }
 0x1cd   : > { %v1674_v17 = vpop.f32.mrb[20].mxu1  ;;  %v850_v18 = vadd.f32 %v1671_v14, %v849_v16 }
 0x1ce   : > { %v709_v19 = vpop.f32.mrb[21].mxu1 }
 0x1cf   : > { %v851_v20 = vadd.f32 %v850_v18, %v709_v19 }
 0x1d1   : > { %v1677_v21 = vpop.f32.mrb[22].mxu1  ;;  %v852_v22 = vadd.f32 %v1674_v17, %v851_v20 }
 0x1d2   : > { %v719_v23 = vpop.f32.mrb[23].mxu1 }
 0x1d3   : > { %v853_v24 = vadd.f32 %v852_v22, %v719_v23 }
 0x1d5   : > { %v1680_v25 = vpop.f32.mrb[24].mxu1  ;;  %v854_v26 = vadd.f32 %v1677_v21, %v853_v24 }
 0x1d6   : > { %v729_v27 = vpop.f32.mrb[25].mxu1 }
 0x1d7   : > { %v855_v28 = vadd.f32 %v854_v26, %v729_v27 }
 0x1d9   : > { %v1683_v29 = vpop.f32.mrb[26].mxu1  ;;  %v856_v30 = vadd.f32 %v1680_v25, %v855_v28 }
 0x1da   : > { %v739_v31 = vpop.f32.mrb[27].mxu1 }
 0x1db   : > { %v857_v32 = vadd.f32 %v856_v30, %v739_v31 }
 0x1dd   : > { %v1686_v33 = vpop.f32.mrb[28].mxu1  ;;  %v858_v34 = vadd.f32 %v1683_v29, %v857_v32 }
 0x1de   : > { %v749_v35 = vpop.f32.mrb[29].mxu1 }
 0x1df   : > { %v859_v36 = vadd.f32 %v858_v34, %v749_v35 }
 0x1e1   : > { %v1689_v37 = vpop.f32.mrb[30].mxu1  ;;  %v860_v38 = vadd.f32 %v1686_v33, %v859_v36 }
 0x1e2   : > { %v759_v39 = vpop.f32.mrb[31].mxu1 }
 0x1e3   : > { %v861_v40 = vadd.f32 %v860_v38, %v759_v39 }
 0x1e5   : > { %v1692_v41 = vpop.f32.mrb[32].mxu1  ;;  %v862_v42 = vadd.f32 %v1689_v37, %v861_v40 }
 0x1e6   : > { %v769_v11 = vpop.f32.mrb[33].mxu1 }
 0x1e7   : > { %v863_v12 = vadd.f32 %v862_v42, %v769_v11 }
 0x1e9   : > { %v1695_v13 = vpop.f32.mrb[34].mxu1  ;;  %v864_v14 = vadd.f32 %v1692_v41, %v863_v12 }
 0x1ea   : > { %v779_v15 = vpop.f32.mrb[35].mxu1 }
 0x1eb   : > { %v865_v16 = vadd.f32 %v864_v14, %v779_v15 }
 0x1ed   : > { %v1698_v17 = vpop.f32.mrb[36].mxu1  ;;  %v866_v18 = vadd.f32 %v1695_v13, %v865_v16 }
 0x1ee   : > { %v789_v19 = vpop.f32.mrb[37].mxu1 }
 0x1ef   : > { %v867_v20 = vadd.f32 %v866_v18, %v789_v19 }
 0x1f1   : > { %v1701_v21 = vpop.f32.mrb[38].mxu1  ;;  %v868_v22 = vadd.f32 %v1698_v17, %v867_v20 }
 0x1f2   : > { %v799_v23 = vpop.f32.mrb[39].mxu1 }
 0x1f3   : > { %v869_v24 = vadd.f32 %v868_v22, %v799_v23 }
 0x1f5   : > { %v1704_v25 = vpop.f32.mrb[40].mxu1  ;;  %v870_v26 = vadd.f32 %v1701_v21, %v869_v24 }
 0x1f6   : > { %v809_v27 = vpop.f32.mrb[41].mxu1 }
 0x1f7   : > { %v871_v28 = vadd.f32 %v870_v26, %v809_v27 }
 0x1f9   : > { %v1707_v29 = vpop.f32.mrb[42].mxu1  ;;  %v872_v30 = vadd.f32 %v1704_v25, %v871_v28 }
 0x1fa   : > { %v819_v31 = vpop.f32.mrb[43].mxu1 }
 0x1fb   : > { %v873_v32 = vadd.f32 %v872_v30, %v819_v31 }
 0x1fd   : > { %v1710_v33 = vpop.f32.mrb[44].mxu1  ;;  %v874_v34 = vadd.f32 %v1707_v29, %v873_v32 }
 0x1fe   : > { %v829_v35 = vpop.f32.mrb[45].mxu1 }
 0x1ff   : > { %v875_v36 = vadd.f32 %v874_v34, %v829_v35 }
 0x201   : > { %v1713_v37 = vpop.f32.mrb[46].mxu1  ;;  %v876_v38 = vadd.f32 %v1710_v33, %v875_v36 }
 0x202   : > { %v839_v39 = vpop.f32.mrb[47].mxu1 }
 0x203   : > { %v877_v40 = vadd.f32 %v876_v38, %v839_v39 }
 0x205   : > { %v878_v41 = vadd.f32 %v1713_v37, %v877_v40 }
 0x207   : > { %v879_v42 = vrot.slane %v878_v41, 4 }
 0x209   : > { %v880_v11 = vadd.f32 %v879_v42, %v878_v41 }
 0x20b   : > { %v881_v12 = vrot.slane %v880_v11, 2 }
 0x20d   : > { %v882_v13 = vadd.f32 %v881_v12, %v880_v11 }
 0x20f   : > { %v883_v14 = vrot.slane %v882_v13, 1 }
 0x211   : > { %v884_v15 = vadd.f32 %v883_v14, %v882_v13 }
 0x213   : > { %v2258_v16 = vmul.f32 0.001953125, %v884_v15 }
 0x215   : > { %v886_v17 = vsub.f32 %v2164_v44, %v2258_v16  ;;  %v887_v18 = vsub.f32 %v2169_v46, %v2258_v16  ;;  %v888_v19 = vsub.f32 %v2162_v43, %v2258_v16  ;;  %v889_v22 = vsub.f32 %v2166_v45, %v2258_v16 }
 0x216   : > { %v890_v23 = vsub.f32 %v2184_v52, %v2258_v16  ;;  %v891_v25 = vsub.f32 %v2189_v54, %v2258_v16  ;;  %v892_v27 = vsub.f32 %v2181_v51, %v2258_v16  ;;  %v893_v29 = vsub.f32 %v2186_v53, %v2258_v16 }
 0x217   : > { %v919_v20 = vmul.f32 %v887_v18, %v887_v18  ;;  %v918_v21 = vmul.f32 %v886_v17, %v886_v17  ;;  %v920_v24 = vmul.f32 %v888_v19, %v888_v19  ;;  %v921_v26 = vmul.f32 %v889_v22, %v889_v22 }
 0x218   : > { %v922_v28 = vmul.f32 %v890_v23, %v890_v23  ;;  %v923_v30 = vmul.f32 %v891_v25, %v891_v25  ;;  %v894_v31 = vsub.f32 %v2204_v60, %v2258_v16  ;;  %v924_v32 = vmul.f32 %v892_v27, %v892_v27 }
 0x219   : > { %1746 = vmatprep.mubr.f32.mxu0 %v918_v21  ;;  %v895_v33 = vsub.f32 %v2209_v62, %v2258_v16  ;;  %v925_v34 = vmul.f32 %v893_v29, %v893_v29  ;;  %v896_v35 = vsub.f32 %v2201_v59, %v2258_v16  ;;  %v897_v37 = vsub.f32 %v2206_v61, %v2258_v16 }
 0x21a   : > { %1747 = vmatmul.mubr.f32.vlgmr.msra.gmra.mrb[16].mxu0 %v919_v20  ;;  %v926_v36 = vmul.f32 %v894_v31, %v894_v31  ;;  %v898_v39 = vsub.f32 %v2224_v4, %v2258_v16  ;;  %v899_v41 = vsub.f32 %v2229_v6, %v2258_v16  ;;  %v900_v11 = vsub.f32 %v2221_v3, %v2258_v16 }
 0x21b   : > { %1749 = vmatprep.mubr.f32.mxu0 %v920_v24  ;;  %v927_v38 = vmul.f32 %v895_v33, %v895_v33  ;;  %v928_v40 = vmul.f32 %v896_v35, %v896_v35  ;;  %v929_v42 = vmul.f32 %v897_v37, %v897_v37  ;;  %v901_v13 = vsub.f32 %v2226_v5, %v2258_v16 }
 0x21c   : > { %v930_v12 = vmul.f32 %v898_v39, %v898_v39  ;;  %v931_v14 = vmul.f32 %v899_v41, %v899_v41  ;;  %v902_v15 = vsub.f32 %v2174_v48, %v2258_v16  ;;  %v932_v17 = vmul.f32 %v900_v11, %v900_v11 }
 0x21d   : > { %v903_v18 = vsub.f32 %v2179_v50, %v2258_v16  ;;  %v933_v19 = vmul.f32 %v901_v13, %v901_v13  ;;  %v904_v20 = vsub.f32 %v2171_v47, %v2258_v16  ;;  %v905_v22 = vsub.f32 %v2177_v49, %v2258_v16 }
 0x21e   : > { %1750 = vmatmul.mubr.f32.gmra.mrb[18].mxu0 %v921_v26  ;;  %v934_v21 = vmul.f32 %v902_v15, %v902_v15  ;;  %v906_v24 = vsub.f32 %v2194_v56, %v2258_v16  ;;  %v907_v26 = vsub.f32 %v2199_v58, %v2258_v16 }
 0x21f   : > { %1752 = vmatprep.mubr.f32.mxu0 %v922_v28  ;;  %v935_v23 = vmul.f32 %v903_v18, %v903_v18  ;;  %v936_v25 = vmul.f32 %v904_v20, %v904_v20  ;;  %v937_v27 = vmul.f32 %v905_v22, %v905_v22  ;;  %v908_v28 = vsub.f32 %v2191_v55, %v2258_v16 }
 0x220   : > { %v938_v29 = vmul.f32 %v906_v24, %v906_v24  ;;  %v939_v31 = vmul.f32 %v907_v26, %v907_v26 }
 0x221   : > { %v940_v33 = vmul.f32 %v908_v28, %v908_v28 }
 0x222   : > { %1753 = vmatmul.mubr.f32.gmra.mrb[20].mxu0 %v923_v30  ;;  %v909_v30 = vsub.f32 %v2197_v57, %v2258_v16 }
 0x223   : > { %1755 = vmatprep.mubr.f32.mxu0 %v924_v32  ;;  %v910_v32 = vsub.f32 %v2214_v0, %v2258_v16 }
 0x224   : > { %v941_v35 = vmul.f32 %v909_v30, %v909_v30 }
 0x225   : > { %v942_v37 = vmul.f32 %v910_v32, %v910_v32 }
 0x226   : > { %1756 = vmatmul.mubr.f32.gmra.mrb[22].mxu0 %v925_v34  ;;  %v911_v34 = vsub.f32 %v2219_v2, %v2258_v16 }
 0x227   : > { %1758 = vmatprep.mubr.f32.mxu0 %v926_v36  ;;  %v912_v36 = vsub.f32 %v2211_v63, %v2258_v16 }
 0x228   : > { %v943_v39 = vmul.f32 %v911_v34, %v911_v34 }
 0x229   : > { %v944_v41 = vmul.f32 %v912_v36, %v912_v36 }
 0x22a   : > { %1759 = vmatmul.mubr.f32.gmra.mrb[24].mxu0 %v927_v38  ;;  %v913_v38 = vsub.f32 %v2217_v1, %v2258_v16 }
 0x22b   : > { %1761 = vmatprep.mubr.f32.mxu0 %v928_v40  ;;  %v914_v40 = vsub.f32 %v2234_v8, %v2258_v16 }
 0x22c   : > { %v945_v11 = vmul.f32 %v913_v38, %v913_v38 }
 0x22d   : > { %v946_v13 = vmul.f32 %v914_v40, %v914_v40 }
 0x22e   : > { %1762 = vmatmul.mubr.f32.gmra.mrb[26].mxu0 %v929_v42  ;;  %v915_v42 = vsub.f32 %v2239_v10, %v2258_v16 }
 0x22f   : > { %1764 = vmatprep.mubr.f32.mxu0 %v930_v12  ;;  %v916_v12 = vsub.f32 %v2231_v7, %v2258_v16 }
 0x230   : > { %v947_v15 = vmul.f32 %v915_v42, %v915_v42 }
 0x232   : > { %1765 = vmatmul.mubr.f32.gmra.mrb[28].mxu0 %v931_v14  ;;  %v917_v14 = vsub.f32 %v2237_v9, %v2258_v16 }
 0x233   : > { %1767 = vmatprep.mubr.f32.mxu0 %v932_v17  ;;  %v948_v17 = vmul.f32 %v916_v12, %v916_v12 }
 0x234   : > { %v949_v18 = vmul.f32 %v917_v14, %v917_v14 }
 0x236   : > { %1768 = vmatmul.mubr.f32.gmra.mrb[30].mxu0 %v933_v19 }
 0x237   : > { %1770 = vmatprep.mubr.f32.mxu0 %v934_v21 }
 0x23a   : > { %1771 = vmatmul.mubr.f32.gmra.mrb[32].mxu0 %v935_v23 }
 0x23b   : > { %1773 = vmatprep.mubr.f32.mxu0 %v936_v25 }
 0x23e   : > { %1774 = vmatmul.mubr.f32.gmra.mrb[34].mxu0 %v937_v27 }
 0x23f   : > { %1776 = vmatprep.mubr.f32.mxu0 %v938_v29 }
 0x242   : > { %1777 = vmatmul.mubr.f32.gmra.mrb[36].mxu0 %v939_v31 }
 0x243   : > { %1779 = vmatprep.mubr.f32.mxu0 %v940_v33 }
 0x246   : > { %1780 = vmatmul.mubr.f32.gmra.mrb[38].mxu0 %v941_v35 }
 0x247   : > { %1782 = vmatprep.mubr.f32.mxu0 %v942_v37 }
 0x24a   : > { %1783 = vmatmul.mubr.f32.gmra.mrb[40].mxu0 %v943_v39 }
 0x24b   : > { %1785 = vmatprep.mubr.f32.mxu0 %v944_v41 }
 0x24e   : > { %1786 = vmatmul.mubr.f32.gmra.mrb[42].mxu0 %v945_v11 }
 0x24f   : > { %1788 = vmatprep.mubr.f32.mxu0 %v946_v13 }
 0x252   : > { %1789 = vmatmul.mubr.f32.gmra.mrb[44].mxu0 %v947_v15 }
 0x253   : > { %1791 = vmatprep.mubr.f32.mxu0 %v948_v17 }
 0x256   : > { %1792 = vmatmul.mubr.f32.gmra.mrb[46].mxu0 %v949_v18 }
 0x2ed   : > { %v1748_v19 = vpop.f32.mrb[16].mxu0 }
 0x2ee   : > { %v1016_v20 = vpop.f32.mrb[17].mxu0 }
 0x2ef   : > { %v1175_v21 = vadd.f32 %v1748_v19, %v1016_v20 }
 0x2f1   : > { %v1751_v22 = vpop.f32.mrb[18].mxu0 }
 0x2f2   : > { %v1026_v23 = vpop.f32.mrb[19].mxu0 }
 0x2f3   : > { %v1176_v24 = vadd.f32 %v1175_v21, %v1026_v23 }
 0x2f5   : > { %v1754_v25 = vpop.f32.mrb[20].mxu0  ;;  %v1177_v26 = vadd.f32 %v1751_v22, %v1176_v24 }
 0x2f6   : > { %v1036_v27 = vpop.f32.mrb[21].mxu0 }
 0x2f7   : > { %v1178_v28 = vadd.f32 %v1177_v26, %v1036_v27 }
 0x2f9   : > { %v1757_v29 = vpop.f32.mrb[22].mxu0  ;;  %v1179_v30 = vadd.f32 %v1754_v25, %v1178_v28 }
 0x2fa   : > { %v1046_v31 = vpop.f32.mrb[23].mxu0 }
 0x2fb   : > { %v1180_v32 = vadd.f32 %v1179_v30, %v1046_v31 }
 0x2fd   : > { %v1760_v33 = vpop.f32.mrb[24].mxu0  ;;  %v1181_v34 = vadd.f32 %v1757_v29, %v1180_v32 }
 0x2fe   : > { %v1056_v35 = vpop.f32.mrb[25].mxu0 }
 0x2ff   : > { %v1182_v36 = vadd.f32 %v1181_v34, %v1056_v35 }
 0x301   : > { %v1763_v37 = vpop.f32.mrb[26].mxu0  ;;  %v1183_v38 = vadd.f32 %v1760_v33, %v1182_v36 }
 0x302   : > { %v1066_v39 = vpop.f32.mrb[27].mxu0 }
 0x303   : > { %v1184_v40 = vadd.f32 %v1183_v38, %v1066_v39 }
 0x305   : > { %v1766_v41 = vpop.f32.mrb[28].mxu0  ;;  %v1185_v42 = vadd.f32 %v1763_v37, %v1184_v40 }
 0x306   : > { %v1076_v11 = vpop.f32.mrb[29].mxu0 }
 0x307   : > { %v1186_v12 = vadd.f32 %v1185_v42, %v1076_v11 }
 0x309   : > { %v1769_v13 = vpop.f32.mrb[30].mxu0  ;;  %v1187_v14 = vadd.f32 %v1766_v41, %v1186_v12 }
 0x30a   : > { %v1086_v15 = vpop.f32.mrb[31].mxu0 }
 0x30b   : > { %v1188_v17 = vadd.f32 %v1187_v14, %v1086_v15 }
 0x30d   : > { %v1772_v18 = vpop.f32.mrb[32].mxu0  ;;  %v1189_v19 = vadd.f32 %v1769_v13, %v1188_v17 }
 0x30e   : > { %v1096_v20 = vpop.f32.mrb[33].mxu0 }
 0x30f   : > { %v1190_v21 = vadd.f32 %v1189_v19, %v1096_v20 }
 0x311   : > { %v1775_v22 = vpop.f32.mrb[34].mxu0  ;;  %v1191_v23 = vadd.f32 %v1772_v18, %v1190_v21 }
 0x312   : > { %v1106_v24 = vpop.f32.mrb[35].mxu0 }
 0x313   : > { %v1192_v25 = vadd.f32 %v1191_v23, %v1106_v24 }
 0x315   : > { %v1778_v26 = vpop.f32.mrb[36].mxu0  ;;  %v1193_v27 = vadd.f32 %v1775_v22, %v1192_v25 }
 0x316   : > { %v1116_v28 = vpop.f32.mrb[37].mxu0 }
 0x317   : > { %v1194_v29 = vadd.f32 %v1193_v27, %v1116_v28  ;;  %v1220_v28 = vlaneseq }
 0x319   : > { %v1781_v30 = vpop.f32.mrb[38].mxu0  ;;  %v1195_v31 = vadd.f32 %v1778_v26, %v1194_v29  ;;  %v1221_v29 = vshrl.u32 %v1220_v28, 7 }
 0x31a   : > { %v1126_v32 = vpop.f32.mrb[39].mxu0 }
 0x31b   : > { %v1196_v33 = vadd.f32 %v1195_v31, %v1126_v32  ;;  %v1222_v31 = vsub.s32 0, %v1221_v29 }
 0x31d   : > { %v1784_v34 = vpop.f32.mrb[40].mxu0  ;;  %v1197_v35 = vadd.f32 %v1781_v30, %v1196_v33  ;;  %v1213_v30 = vld [vmem:[%s2497_s3] sm:$0x1] }
 0x31e   : > { %v1136_v36 = vpop.f32.mrb[41].mxu0 }
 0x31f   : > { %v1198_v37 = vadd.f32 %v1197_v35, %v1136_v36 }
 0x321   : > { %v1787_v38 = vpop.f32.mrb[42].mxu0  ;;  %v1199_v39 = vadd.f32 %v1784_v34, %v1198_v37  ;;  %v1217_v34 = vld [vmem:[%s2497_s3 + $0x1] sm:$0x1] }
 0x322   : > { %v1146_v40 = vpop.f32.mrb[43].mxu0 }
 0x323   : > { %v1200_v41 = vadd.f32 %v1199_v39, %v1146_v40 }
 0x325   : > { %v1790_v42 = vpop.f32.mrb[44].mxu0  ;;  %v1201_v11 = vadd.f32 %v1787_v38, %v1200_v41 }
 0x326   : > { %v1156_v12 = vpop.f32.mrb[45].mxu0 }
 0x327   : > { %v1202_v13 = vadd.f32 %v1201_v11, %v1156_v12 }
 0x329   : > { %v1793_v14 = vpop.f32.mrb[46].mxu0  ;;  %v1203_v15 = vadd.f32 %v1790_v42, %v1202_v13 }
 0x32a   : > { %v1166_v17 = vpop.f32.mrb[47].mxu0 }
 0x32b   : > { %v1204_v18 = vadd.f32 %v1203_v15, %v1166_v17 }
 0x32d   : > { %v1205_v19 = vadd.f32 %v1793_v14, %v1204_v18 }
 0x32f   : > { %v1206_v20 = vrot.slane %v1205_v19, 4 }
 0x331   : > { %v1207_v21 = vadd.f32 %v1206_v20, %v1205_v19 }
 0x333   : > { %v1208_v22 = vrot.slane %v1207_v21, 2 }
 0x335   : > { %v1209_v23 = vadd.f32 %v1208_v22, %v1207_v21 }
 0x337   : > { %v1210_v24 = vrot.slane %v1209_v23, 1 }
 0x339   : > { %v1211_v25 = vadd.f32 %v1210_v24, %v1209_v23 }
 0x33b   : > { %v1212_v26 = vmul.f32 0.001953125, %v1211_v25 }
 0x33d   : > { %v1214_v27 = vadd.f32 1e-05, %v1212_v26 }
 0x33f   : > { %1924 = vrsqrt.f32 %v1214_v27 }
 0x349   : > { %v1925_v32 = vpop.eup %1924 }
 0x34a   : > { %v1216_v33 = vmul.f32 %v1925_v32, %v1213_v30 }
 0x34c   : > { %v1218_v35 = vmul.f32 %v1216_v33, %v2258_v16  ;;  %v1223_v36 = vrot.slane %v1216_v33, %v1222_v31 }
 0x34e   : > { %v1219_v37 = vsub.f32 %v1217_v34, %v1218_v35  ;;  %v1224_v38 = vmul.f32 %v1223_v36, %v2164_v44  ;;  %v1225_v39 = vmul.f32 %v1223_v36, %v2169_v46  ;;  %v1226_v40 = vmul.f32 %v2162_v43, %v1223_v36 }
 0x34f   : > { %v1227_v41 = vmul.f32 %v2166_v45, %v1223_v36  ;;  %v1228_v42 = vmul.f32 %v1223_v36, %v2184_v52  ;;  %v1229_v11 = vmul.f32 %v1223_v36, %v2189_v54  ;;  %v1230_v12 = vmul.f32 %v2181_v51, %v1223_v36 }
 0x350   : > { %v1259_v13 = vrot.slane %v1219_v37, %v1222_v31  ;;  %v1231_v14 = vmul.f32 %v2186_v53, %v1223_v36  ;;  %v1232_v16 = vmul.f32 %v1223_v36, %v2204_v60  ;;  %v1233_v15 = vmul.f32 %v1223_v36, %v2209_v62 }
 0x351   : > { %v1234_v44 = vmul.f32 %v2201_v59, %v1223_v36  ;;  %v1235_v46 = vmul.f32 %v2206_v61, %v1223_v36  ;;  %v1236_v43 = vmul.f32 %v1223_v36, %v2224_v4  ;;  %v1237_v45 = vmul.f32 %v1223_v36, %v2229_v6 }
 0x352   : > { %v1238_v52 = vmul.f32 %v2221_v3, %v1223_v36  ;;  %v1239_v54 = vmul.f32 %v2226_v5, %v1223_v36  ;;  %v1240_v51 = vmul.f32 %v1223_v36, %v2174_v48  ;;  %v1241_v53 = vmul.f32 %v1223_v36, %v2179_v50 }
 0x353   : > { %v1242_v60 = vmul.f32 %v2171_v47, %v1223_v36  ;;  %v1243_v62 = vmul.f32 %v2177_v49, %v1223_v36  ;;  %v1244_v59 = vmul.f32 %v1223_v36, %v2194_v56  ;;  %v1245_v61 = vmul.f32 %v1223_v36, %v2199_v58 }
 0x354   : > { %v1246_v4 = vmul.f32 %v2191_v55, %v1223_v36  ;;  %v1247_v6 = vmul.f32 %v2197_v57, %v1223_v36  ;;  %v1248_v3 = vmul.f32 %v1223_v36, %v2214_v0  ;;  %v1249_v5 = vmul.f32 %v1223_v36, %v2219_v2 }
 0x355   : > { %v1250_v48 = vmul.f32 %v2211_v63, %v1223_v36  ;;  %v1251_v50 = vmul.f32 %v2217_v1, %v1223_v36  ;;  %v1252_v47 = vmul.f32 %v1223_v36, %v2234_v8  ;;  %v1253_v49 = vmul.f32 %v1223_v36, %v2239_v10 }
 0x356   : > { %v1254_v56 = vmul.f32 %v2231_v7, %v1223_v36  ;;  %v1255_v58 = vmul.f32 %v2237_v9, %v1223_v36  ;;  %v1260_v55 = vadd.f32 %v1259_v13, %v1224_v38  ;;  %v1261_v17 = vadd.f32 %v1259_v13, %v1225_v39 }
 0x357   : > { %v1262_v57 = vadd.f32 %v1259_v13, %v1226_v40  ;;  %v1263_v0 = vadd.f32 %v1259_v13, %v1227_v41  ;;  %v1264_v18 = vadd.f32 %v1259_v13, %v1228_v42  ;;  %v1265_v2 = vadd.f32 %v1259_v13, %v1229_v11 }
 0x358   : > { %v1266_v19 = vadd.f32 %v1259_v13, %v1230_v12  ;;  %v1267_v63 = vadd.f32 %v1259_v13, %v1231_v14  ;;  %v1268_v20 = vadd.f32 %v1259_v13, %v1232_v16  ;;  %v1269_v1 = vadd.f32 %v1259_v13, %v1233_v15 }
 0x359   : > { %v1270_v21 = vadd.f32 %v1259_v13, %v1234_v44  ;;  %v1271_v8 = vadd.f32 %v1259_v13, %v1235_v46  ;;  %v1272_v22 = vadd.f32 %v1259_v13, %v1236_v43  ;;  %v1273_v10 = vadd.f32 %v1259_v13, %v1237_v45 }
 0x35a   : > { %v1274_v7 = vadd.f32 %v1259_v13, %v1238_v52  ;;  %v1275_v9 = vadd.f32 %v1259_v13, %v1239_v54  ;;  %v1276_v23 = vadd.f32 %v1259_v13, %v1240_v51  ;;  %v1277_v24 = vadd.f32 %v1259_v13, %v1241_v53 }
 0x35b   : > { %v2366_v25 = vadd.f32 %v1259_v13, %v1242_v60  ;;  %v2368_v26 = vadd.f32 %v1259_v13, %v1243_v62  ;;  %v2370_v27 = vadd.f32 %v1259_v13, %v1244_v59  ;;  %v2372_v28 = vadd.f32 %v1259_v13, %v1245_v61 }
 0x35c   : > { %v2374_v29 = vadd.f32 %v1259_v13, %v1246_v4  ;;  %v2376_v30 = vadd.f32 %v1259_v13, %v1247_v6  ;;  %v2378_v31 = vadd.f32 %v1259_v13, %v1248_v3  ;;  %v2380_v32 = vadd.f32 %v1259_v13, %v1249_v5 }
 0x35d   : > { %v2382_v33 = vadd.f32 %v1259_v13, %v1250_v48  ;;  %v2384_v34 = vadd.f32 %v1259_v13, %v1251_v50  ;;  %v2386_v35 = vadd.f32 %v1259_v13, %v1252_v47  ;;  %v2388_v36 = vadd.f32 %v1259_v13, %v1253_v49 }
 0x35e   : > { %v2390_v37 = vadd.f32 %v1259_v13, %v1254_v56  ;;  %v2392_v38 = vadd.f32 %v1259_v13, %v1255_v58  ;;  %v1292_v39 = vmax.f32 %v1260_v55, 0.0  ;;  %v1293_v40 = vmax.f32 %v1261_v17, 0.0 }
 0x35f   : > { %v1294_v41 = vmax.f32 %v1262_v57, 0.0  ;;  %v1295_v42 = vmax.f32 %v1263_v0, 0.0  ;;  %v1296_v11 = vmax.f32 %v1264_v18, 0.0  ;;  %v1297_v12 = vmax.f32 %v1265_v2, 0.0 }
 0x360   : > { %v1298_v14 = vmax.f32 %v1266_v19, 0.0  ;;  %v1299_v16 = vmax.f32 %v1267_v63, 0.0  ;;  %v1300_v15 = vmax.f32 %v1268_v20, 0.0  ;;  %v1301_v44 = vmax.f32 %v1269_v1, 0.0  ;;  %1324 = vst [vmem:[%s2394_s23] sm:$0xff] %v1292_v39  ;;  %1325 = vst [vmem:[%s2394_s23 + $0x8] sm:$0xff] %v1293_v40 }
 0x361   : > { %v1302_v13 = vmax.f32 %v1270_v21, 0.0  ;;  %v1303_v46 = vmax.f32 %v1271_v8, 0.0  ;;  %v1304_v43 = vmax.f32 %v1272_v22, 0.0  ;;  %v1305_v45 = vmax.f32 %v1273_v10, 0.0  ;;  %1326 = vst [vmem:[%s2394_s23 + $0x10] sm:$0xff] %v1294_v41  ;;  %1327 = vst [vmem:[%s2394_s23 + $0x18] sm:$0xff] %v1295_v42 }
 0x362   : > { %1328 = vst [vmem:[%s2394_s23 + $0x20] sm:$0xff] %v1296_v11  ;;  %1329 = vst [vmem:[%s2394_s23 + $0x28] sm:$0xff] %v1297_v12  ;;  %v1306_v52 = vmax.f32 %v1274_v7, 0.0  ;;  %v1307_v54 = vmax.f32 %v1275_v9, 0.0  ;;  %v1308_v51 = vmax.f32 %v1276_v23, 0.0  ;;  %v1309_v53 = vmax.f32 %v1277_v24, 0.0 }
 0x363   : > { %1330 = vst [vmem:[%s2394_s23 + $0x30] sm:$0xff] %v1298_v14  ;;  %1331 = vst [vmem:[%s2394_s23 + $0x38] sm:$0xff] %v1299_v16  ;;  %v1310_v60 = vmax.f32 %v2366_v25, 0.0  ;;  %v1311_v62 = vmax.f32 %v2368_v26, 0.0  ;;  %v1312_v59 = vmax.f32 %v2370_v27, 0.0  ;;  %v1313_v61 = vmax.f32 %v2372_v28, 0.0 }
 0x364   : > { %1332 = vst [vmem:[%s2394_s23 + $0x40] sm:$0xff] %v1300_v15  ;;  %1333 = vst [vmem:[%s2394_s23 + $0x48] sm:$0xff] %v1301_v44  ;;  %v1314_v4 = vmax.f32 %v2374_v29, 0.0  ;;  %v1315_v6 = vmax.f32 %v2376_v30, 0.0  ;;  %v1316_v3 = vmax.f32 %v2378_v31, 0.0  ;;  %v1317_v5 = vmax.f32 %v2380_v32, 0.0 }
 0x365   : > { %1334 = vst [vmem:[%s2394_s23 + $0x50] sm:$0xff] %v1302_v13  ;;  %1335 = vst [vmem:[%s2394_s23 + $0x58] sm:$0xff] %v1303_v46  ;;  %v1318_v48 = vmax.f32 %v2382_v33, 0.0  ;;  %v1319_v50 = vmax.f32 %v2384_v34, 0.0  ;;  %v1320_v47 = vmax.f32 %v2386_v35, 0.0  ;;  %v1321_v49 = vmax.f32 %v2388_v36, 0.0 }
 0x366   : > { %1336 = vst [vmem:[%s2394_s23 + $0x60] sm:$0xff] %v1304_v43  ;;  %1337 = vst [vmem:[%s2394_s23 + $0x68] sm:$0xff] %v1305_v45  ;;  %v1322_v56 = vmax.f32 %v2390_v37, 0.0  ;;  %v1323_v58 = vmax.f32 %v2392_v38, 0.0 }
 0x367   : > { %1338 = vst [vmem:[%s2394_s23 + $0x70] sm:$0xff] %v1306_v52  ;;  %1339 = vst [vmem:[%s2394_s23 + $0x78] sm:$0xff] %v1307_v54 }
 0x368   : > { %1340 = vst [vmem:[%s2394_s23 + $0x80] sm:$0xff] %v1308_v51  ;;  %1341 = vst [vmem:[%s2394_s23 + $0x88] sm:$0xff] %v1309_v53 }
 0x369   : > { %1342 = vst [vmem:[%s2394_s23 + $0x90] sm:$0xff] %v1310_v60  ;;  %1343 = vst [vmem:[%s2394_s23 + $0x98] sm:$0xff] %v1311_v62 }
 0x36a   : > { %1344 = vst [vmem:[%s2394_s23 + $0xa0] sm:$0xff] %v1312_v59  ;;  %1345 = vst [vmem:[%s2394_s23 + $0xa8] sm:$0xff] %v1313_v61 }
 0x36b   : > { %1346 = vst [vmem:[%s2394_s23 + $0xb0] sm:$0xff] %v1314_v4  ;;  %1347 = vst [vmem:[%s2394_s23 + $0xb8] sm:$0xff] %v1315_v6 }
 0x36c   : > { %1348 = vst [vmem:[%s2394_s23 + $0xc0] sm:$0xff] %v1316_v3  ;;  %1349 = vst [vmem:[%s2394_s23 + $0xc8] sm:$0xff] %v1317_v5 }
 0x36d   : > { %1350 = vst [vmem:[%s2394_s23 + $0xd0] sm:$0xff] %v1318_v48  ;;  %1351 = vst [vmem:[%s2394_s23 + $0xd8] sm:$0xff] %v1319_v50 }
 0x36e   : > { %1352 = vst [vmem:[%s2394_s23 + $0xe0] sm:$0xff] %v1320_v47  ;;  %1353 = vst [vmem:[%s2394_s23 + $0xe8] sm:$0xff] %v1321_v49 }
 0x36f   : > { %1354 = vst [vmem:[%s2394_s23 + $0xf0] sm:$0xff] %v1322_v56  ;;  %1355 = vst [vmem:[%s2394_s23 + $0xf8] sm:$0xff] %v1323_v58 }
 0x370   : > { %1939 = shalt.err (!%p1936_p3)
}
 0x371   : > { %s1940_s10 = scalar_lea.hbm %s2435_s30, 4096  ;;  %s1944_s13 = scalar_lea.hbm %s2498_s4, 8192 }
 0x372   : > { %p1941_p4 = scmp.ne.s32.totalorder %s2435_s30, %s1940_s10  ;;  %p1945_p9 = scmp.lt.u32.totalorder %s2435_s30, %s2498_s4 }
 0x373   : > { %p1946_p10 = scmp.lt.u32.totalorder %s1944_s13, %s1940_s10  ;;  %p1948_p12 = scmp.lt.u32.totalorder %s1940_s10, %s2435_s30 }
 0x374   : > { %p1942_p7 = pnand %p1941_p4, %p2056_p5 }
 0x375   : > { %p1947_p11 = por %p1946_p10, %p1945_p9 }
 0x376   : > { %p1943_p8 = pneg %p1942_p7 }
 0x377   : > { %p1949_p13 = por %p1948_p12, %p1947_p11 }
 0x379   : > { %p1950_p0 = pnand %p1949_p13, %p1943_p8 }
 0x37b   : > { %1953 = shalt.err (!%p1950_p0)
}
 0x37c   : > { %s1991_s22 = smov 128   ;;  %s1992_s23 = smov 8  }
 0x37d   : > { %1864 = dma.vmem_to_hbm [thread:$0]  (%p2056_p5), %s2437_s28, 4096, %s2435_s30, %s2453_s5, %s1991_s22, %s1991_s22, %s1992_s23  }
 0x37e PF: > { %p1870_p1 = scmp.ge.s32.totalorder %s1988_s18, 2  ;;  %s1385_s27 = sand.u32 1, %s1976_s15  }
 0x37f   : > { %s1386_s19 = scalar_lea.sflag [#allocation4], %s1385_s27 }
 0x380   : > { %p1867_p2 = pnand %p1870_p1, %p2060_p6 }
 0x382   : > { %1971 = dma.done.wait (!%p1867_p2), %s1386_s19, 4096  }
 0x383   : > { %1973 = vsyncadd (!%p1867_p2), %s1386_s19, 4294963200  ;;  %p14_p3 = scmp.ge.s32.totalorder %s2043_s21, 4   ;;  %s2501_s15 = smov %s1980_s16 }
 0x384   : > { %s2502_s16 = smov %s1984_s17  ;;  %s2503_s17 = smov %s2054_s24 }
 0x385   : > { %s2504_s18 = smov %s2043_s21  ;;  %16 = sbr.rel (!%p14_p3) target bundleno = 3 (0x3), region = 71 }
 0x38c   :  { %1391 = vsyncpa [#allocation4], 1 }
 0x38d   :  { %1393 = vsyncpa [#allocation4 + $0x1], 1 }

</bundles_post_ra>
